<compile_context>
chip_gen: v5e
topology: v5e:2x2
jax: 0.10.0
libtpu: 0.0.40
codegen_flags: <defaults>
</compile_context>

<pallas_src>
import functools
import re

import jax
import jax.numpy as jnp
from jax.experimental import pallas as pl
from jax.experimental.pallas import tpu as pltpu


# ---------------------------------------------------------------------------
# Architecture selection helpers.
# ---------------------------------------------------------------------------
def _tpu_generation():
    """Best-effort TPU generation (5 -> v5e/v5p, 6 -> v6e, 7 -> v7x, ...)."""
    try:
        kind = jax.devices()[0].device_kind.lower()
    except Exception:
        return 6
    m = re.search(r"\d+", kind)
    return int(m.group(0)) if m else 6


def _arch_params():
    gen = _tpu_generation()
    tile = 128 if gen <= 5 else 256          # v5e/v5p: 128-wide MXU; v6e/v7x: 256
    if gen >= 7:
        vmem_limit = 48 * 1024 * 1024        # v7x: 64 MiB physical VMEM per TC
    elif gen >= 5:
        vmem_limit = 96 * 1024 * 1024        # v5e/v6e: 128 MiB physical
    else:
        vmem_limit = 32 * 1024 * 1024
    return gen, tile, vmem_limit


# ---------------------------------------------------------------------------
# One-time weight preparation (keep OUT of the per-call jitted forward).
# ---------------------------------------------------------------------------
def prepare_attention_weights(wq, wk, wv, wo, bo, num_heads):
    """Fold softmax scale into Wq, fuse QKV weights, per-head Wo slices."""
    D = wq.shape[0]
    hd = D // num_heads
    scale = 1.0 / (hd ** 0.5)
    wqkv = jnp.concatenate([wq * scale, wk, wv], axis=1)          # (D, 3D)
    wo_h = wo.reshape(num_heads, hd, D)                           # (H, hd, D)
    bo2 = bo.reshape(1, D)                                        # 2-D for TPU layout
    return wqkv, wo_h, bo2


# ---------------------------------------------------------------------------
# Kernel 1: fused QKV projection (one MXU pass against the stacked weight).
# ---------------------------------------------------------------------------
def qkv_proj_kernel(x_ref, wqkv_ref, q_ref, k_ref, v_ref):
    x = x_ref[0]                                                  # (TM, D)
    qkv = jnp.dot(x, wqkv_ref[...], preferred_element_type=jnp.float32)  # (TM, 3D)
    D = q_ref.shape[-1]
    q_ref[0] = qkv[:, :D].astype(q_ref.dtype)                     # scale already folded in
    k_ref[0] = qkv[:, D:2 * D].astype(k_ref.dtype)
    v_ref[0] = qkv[:, 2 * D:].astype(v_ref.dtype)


def qkv_projection(x, wqkv, *, tile_m, vmem_limit):
    B, S, D = x.shape
    TM = min(tile_m, S)
    out = jax.ShapeDtypeStruct((B, S, D), x.dtype)
    # NOTE(v7x, large D): for D >= ~2k the resident (D, 3D) weight plus the
    # (TM, 3D) f32 intermediate approach the 64 MiB VMEM; add an N grid axis
    # over the 3D output columns (TN ~ 512-1024) in that regime.
    return pl.pallas_call(
        qkv_proj_kernel,
        out_shape=(out, out, out),
        grid=(B, pl.cdiv(S, TM)),
        in_specs=[
            pl.BlockSpec((1, TM, D), lambda b, s: (b, s, 0)),
            pl.BlockSpec((D, 3 * D), lambda b, s: (0, 0)),        # resident weight
        ],
        out_specs=(
            pl.BlockSpec((1, TM, D), lambda b, s: (b, s, 0)),
            pl.BlockSpec((1, TM, D), lambda b, s: (b, s, 0)),
            pl.BlockSpec((1, TM, D), lambda b, s: (b, s, 0)),
        ),
        compiler_params=pltpu.CompilerParams(
            dimension_semantics=("parallel", "parallel"),
            vmem_limit_bytes=vmem_limit),
    )(x, wqkv)


# ---------------------------------------------------------------------------
# Kernel 2: attention core.  grid = (B, H, query-tiles), query tiles innermost
# so the full-S K / V blocks (index depends only on (b, h)) are NOT re-fetched
# across query tiles.
# ---------------------------------------------------------------------------
def attention_core_kernel(q_ref, kT_ref, v_ref, ctx_ref, *, exp_dtype):
    q = q_ref[0, 0]                                               # (TQ, hd), pre-scaled
    kT = kT_ref[0, 0]                                             # (hd, S) lane-dense in S
    v = v_ref[0, 0]                                               # (S, hd)

    # Plain q @ kT: no per-step transpose, f32 scores on the MXU.
    s = jnp.dot(q, kT, preferred_element_type=jnp.float32)        # (TQ, S)
    m = jnp.max(s, axis=-1, keepdims=True)
    # bf16 exp only for bf16 inputs on v6e/v7x (exp_dtype == f32 otherwise).
    p = jnp.exp((s - m).astype(exp_dtype))
    l = jnp.sum(p.astype(jnp.float32), axis=-1, keepdims=True)    # (TQ, 1)

    # PV in the input dtype (fast MXU path for bf16), f32 accumulation.
    ctx = jnp.dot(p.astype(v.dtype), v, preferred_element_type=jnp.float32)
    # Deferred normalization: TQ*hd elements, approx reciprocal on the EUP.
    ctx = ctx * pl.reciprocal(l, approx=True)
    ctx_ref[0, 0] = ctx.astype(ctx_ref.dtype)


# ---------------------------------------------------------------------------
# Kernel 3: output projection with heads as the innermost reduction axis.
# ---------------------------------------------------------------------------
def out_proj_kernel(ctx_ref, wo_ref, bo_ref, o_ref, acc_ref):
    h = pl.program_id(2)

    @pl.when(h == 0)
    def _():
        acc_ref[...] = jnp.zeros_like(acc_ref)

    # wo_ref holds the full (H, hd, D) weight (constant index map -> loaded
    # once, VMEM-resident); slice this head's (hd, D) piece dynamically.
    acc_ref[...] += jnp.dot(ctx_ref[0, 0], wo_ref[h],
                            preferred_element_type=jnp.float32)

    @pl.when(h == pl.num_programs(2) - 1)
    def _():
        # Single lane-dense (TQ, D) store; bias broadcast-added once.
        o_ref[0] = (acc_ref[...] + bo_ref[...]).astype(o_ref.dtype)


# ---------------------------------------------------------------------------
# Forward pass.
# ---------------------------------------------------------------------------
@functools.partial(jax.jit,
                   static_argnames=("num_heads", "tile", "vmem_limit", "exp_bf16"))
def _attention_jit(x, wqkv, wo_h, bo2, *, num_heads, tile, vmem_limit, exp_bf16):
    B, S, D = x.shape
    H = num_heads
    hd = D // H
    TQ = min(tile, S)
    num_qt = pl.cdiv(S, TQ)
    exp_dtype = jnp.bfloat16 if exp_bf16 else jnp.float32

    # ---- Kernel 1: fused QKV projection.
    q, k, v = qkv_projection(x, wqkv, tile_m=tile, vmem_limit=vmem_limit)

    # ---- Layout plumbing (one-time XLA transposes): per-head views.  K is
    # stored head-major *transposed* (B, H, hd, S) so the score matmul needs
    # no per-step XLU transpose and its K tile is lane-dense in S.
    # (When hd is a multiple of 128 these transposes can be skipped by
    # indexing head columns of the (B, S, D) projections directly.)
    qh = q.reshape(B, S, H, hd).transpose(0, 2, 1, 3)             # (B, H, S, hd)
    vh = v.reshape(B, S, H, hd).transpose(0, 2, 1, 3)             # (B, H, S, hd)
    kT = k.reshape(B, S, H, hd).transpose(0, 2, 3, 1)             # (B, H, hd, S)

    # ---- Kernel 2: attention core.  K/V index maps ignore qi, and qi is the
    # innermost ("arbitrary") axis, so K/V are DMA'd once per (b, h) and stay
    # resident across all query tiles.  B*H provides the parallel work for
    # megacore (v7x's 2 TensorCores).
    # NOTE: for very long S, add a KV grid axis with online (flash-style)
    # max/sum accumulation and re-derive the VMEM budget (esp. v7x 64 MiB).
    ctx = pl.pallas_call(
        functools.partial(attention_core_kernel, exp_dtype=exp_dtype),
        out_shape=jax.ShapeDtypeStruct((B, H, S, hd), x.dtype),
        grid=(B, H, num_qt),
        in_specs=[
            pl.BlockSpec((1, 1, TQ, hd), lambda b, h, qi: (b, h, qi, 0)),  # q tile
            pl.BlockSpec((1, 1, hd, S), lambda b, h, qi: (b, h, 0, 0)),    # K^T (resident)
            pl.BlockSpec((1, 1, S, hd), lambda b, h, qi: (b, h, 0, 0)),    # V   (resident)
        ],
        out_specs=pl.BlockSpec((1, 1, TQ, hd), lambda b, h, qi: (b, h, qi, 0)),
        compiler_params=pltpu.CompilerParams(
            dimension_semantics=("parallel", "parallel", "arbitrary"),
            vmem_limit_bytes=vmem_limit),
    )(qh, kT, vh)

    # ---- Kernel 3: output projection (heads = reduction axis), lane-dense
    # (TQ, D) f32 accumulator, Wo / bias resident for the whole grid.
    out = pl.pallas_call(
        out_proj_kernel,
        out_shape=jax.ShapeDtypeStruct((B, S, D), x.dtype),
        grid=(B, num_qt, H),
        in_specs=[
            pl.BlockSpec((1, 1, TQ, hd), lambda b, qi, h: (b, h, qi, 0)),  # ctx tile
            pl.BlockSpec((H, hd, D), lambda b, qi, h: (0, 0, 0)),          # full Wo
            pl.BlockSpec((1, D), lambda b, qi, h: (0, 0)),                 # bias
        ],
        out_specs=pl.BlockSpec((1, TQ, D), lambda b, qi, h: (b, qi, 0)),
        scratch_shapes=[pltpu.VMEM((TQ, D), jnp.float32)],
        compiler_params=pltpu.CompilerParams(
            dimension_semantics=("parallel", "parallel", "arbitrary"),
            vmem_limit_bytes=vmem_limit),
    )(ctx, wo_h, bo2)
    return out


def multi_head_attention(x, wqkv, wo_h, bo2, num_heads):
    gen, tile, vmem_limit = _arch_params()
    # bf16 softmax exp only pays off (and is only supported) on v6e/v7x.
    exp_bf16 = bool(x.dtype == jnp.bfloat16 and gen >= 6)
    return _attention_jit(x, wqkv, wo_h, bo2, num_heads=num_heads, tile=tile,
                          vmem_limit=vmem_limit, exp_bf16=exp_bf16)


# ---------------------------------------------------------------------------
# Pure-JAX reference mirroring the PyTorch forward exactly.
# ---------------------------------------------------------------------------
def attention_reference(x, wq, wk, wv, wo, bo, num_heads):
    B, S, D = x.shape
    hd = D // num_heads
    with jax.default_matmul_precision("float32"):
        q = x @ wq
        k = x @ wk
        v = x @ wv
        q = q.reshape(B, S, num_heads, hd).transpose(0, 2, 1, 3)
        k = k.reshape(B, S, num_heads, hd).transpose(0, 2, 1, 3)
        v = v.reshape(B, S, num_heads, hd).transpose(0, 2, 1, 3)
        attn = jnp.einsum("bhqd,bhkd->bhqk", q, k) / (hd ** 0.5)
        attn = jax.nn.softmax(attn, axis=-1)
        ctx = jnp.einsum("bhqk,bhkd->bhqd", attn, v)
        ctx = ctx.transpose(0, 2, 1, 3).reshape(B, S, D)
        return ctx @ wo + bo.reshape(1, D)


if __name__ == "__main__":
    # Small shapes consistent with the module: batch=2, seq=8, dim=32, heads=4.
    B, S, D, H = 2, 8, 32, 4
    key = jax.random.PRNGKey(0)
    kx, kq, kk, kv, ko, kb = jax.random.split(key, 6)

    x = jax.random.normal(kx, (B, S, D), dtype=jnp.float32)

    # Deterministic PyTorch-Linear-style uniform(-1/sqrt(in), 1/sqrt(in)) init.
    bound = 1.0 / (D ** 0.5)
    init = lambda k, shape: jax.random.uniform(k, shape, jnp.float32, -bound, bound)
    wq = init(kq, (D, D))          # stored as (in, out)
    wk = init(kk, (D, D))
    wv = init(kv, (D, D))
    wo = init(ko, (D, D))
    bo = init(kb, (D,))

    # Weight prep done ONCE, outside the jitted forward.
    wqkv, wo_h, bo2 = prepare_attention_weights(wq, wk, wv, wo, bo, H)

    out = multi_head_attention(x, wqkv, wo_h, bo2, num_heads=H)
    out = jax.block_until_ready(out)

    ref = attention_reference(x, wq, wk, wv, wo, bo, H)
    assert out.shape == (B, S, D)
    max_err = float(jnp.max(jnp.abs(out - ref)))
    # Tolerance accounts for the approx (EUP) reciprocal in the normalization.
    assert jnp.allclose(out, ref, atol=2e-3, rtol=2e-3), \
        f"mismatch vs JAX reference (max abs err = {max_err})"

    print("KERNEL_OK")
</pallas_src>

<mosaic_0001>
module attributes {stable_mosaic.version = 11 : i64} {
  func.func @qkv_proj_kernel(%arg0: i32, %arg1: i32, %arg2: memref<1x8x32xf32, #tpu.memory_space<vmem>>, %arg3: memref<32x96xf32, #tpu.memory_space<vmem>>, %arg4: memref<1x8x32xf32, #tpu.memory_space<vmem>>, %arg5: memref<1x8x32xf32, #tpu.memory_space<vmem>>, %arg6: memref<1x8x32xf32, #tpu.memory_space<vmem>>) attributes {dimension_semantics = [#tpu.dimension_semantics<parallel>, #tpu.dimension_semantics<parallel>], iteration_bounds = array<i64: 2, 1>, scalar_prefetch = 0 : i64, scratch_operands = 0 : i64, tpu.core_type = #tpu.core_type<tc>, window_params = [{transform_indices = @transform_0, window_bounds = array<i64: 1, 8, 32>}, {pipeline_mode = #tpu.pipeline_mode<synchronous>, transform_indices = @transform_1, window_bounds = array<i64: 32, 96>}, {transform_indices = @transform_2, window_bounds = array<i64: 1, 8, 32>}, {transform_indices = @transform_3, window_bounds = array<i64: 1, 8, 32>}, {transform_indices = @transform_4, window_bounds = array<i64: 1, 8, 32>}]} {
    %c0 = arith.constant 0 : index
    %c0_0 = arith.constant 0 : index
    %c0_1 = arith.constant 0 : index
    %0 = vector.load %arg2[%c0, %c0_0, %c0_1] : memref<1x8x32xf32, #tpu.memory_space<vmem>>, vector<1x8x32xf32>
    %1 = vector.shape_cast %0 : vector<1x8x32xf32> to vector<8x32xf32>
    %c0_2 = arith.constant 0 : index
    %c0_3 = arith.constant 0 : index
    %2 = vector.load %arg3[%c0_2, %c0_3] : memref<32x96xf32, #tpu.memory_space<vmem>>, vector<32x96xf32>
    %cst = arith.constant dense<0.000000e+00> : vector<8x96xf32>
    %3 = tpu.matmul %1, %2, %cst {dimension_numbers = #tpu.dot_dimension_numbers<[1], [0], [0], [1], [0, 0, 1, 1], [], []>} : vector<8x32xf32>, vector<32x96xf32>, vector<8x96xf32> -> vector<8x96xf32>
    %4 = vector.extract_strided_slice %3 {offsets = [0, 0], sizes = [8, 32], strides = [1, 1]} : vector<8x96xf32> to vector<8x32xf32>
    %c0_4 = arith.constant 0 : index
    %c0_5 = arith.constant 0 : index
    %c0_6 = arith.constant 0 : index
    %5 = vector.load %arg4[%c0_4, %c0_5, %c0_6] : memref<1x8x32xf32, #tpu.memory_space<vmem>>, vector<1x8x32xf32>
    %6 = vector.shape_cast %5 : vector<1x8x32xf32> to vector<8x32xf32>
    %7 = vector.shape_cast %4 : vector<8x32xf32> to vector<1x8x32xf32>
    tpu.vector_store %arg4[%c0_4, %c0_5, %c0_6], %7 {strides = array<i32>} : memref<1x8x32xf32, #tpu.memory_space<vmem>>, vector<1x8x32xf32>,
    %8 = vector.extract_strided_slice %3 {offsets = [0, 32], sizes = [8, 32], strides = [1, 1]} : vector<8x96xf32> to vector<8x32xf32>
    %c0_7 = arith.constant 0 : index
    %c0_8 = arith.constant 0 : index
    %c0_9 = arith.constant 0 : index
    %9 = vector.load %arg5[%c0_7, %c0_8, %c0_9] : memref<1x8x32xf32, #tpu.memory_space<vmem>>, vector<1x8x32xf32>
    %10 = vector.shape_cast %9 : vector<1x8x32xf32> to vector<8x32xf32>
    %11 = vector.shape_cast %8 : vector<8x32xf32> to vector<1x8x32xf32>
    tpu.vector_store %arg5[%c0_7, %c0_8, %c0_9], %11 {strides = array<i32>} : memref<1x8x32xf32, #tpu.memory_space<vmem>>, vector<1x8x32xf32>,
    %12 = vector.extract_strided_slice %3 {offsets = [0, 64], sizes = [8, 32], strides = [1, 1]} : vector<8x96xf32> to vector<8x32xf32>
    %c0_10 = arith.constant 0 : index
    %c0_11 = arith.constant 0 : index
    %c0_12 = arith.constant 0 : index
    %13 = vector.load %arg6[%c0_10, %c0_11, %c0_12] : memref<1x8x32xf32, #tpu.memory_space<vmem>>, vector<1x8x32xf32>
    %14 = vector.shape_cast %13 : vector<1x8x32xf32> to vector<8x32xf32>
    %15 = vector.shape_cast %12 : vector<8x32xf32> to vector<1x8x32xf32>
    tpu.vector_store %arg6[%c0_10, %c0_11, %c0_12], %15 {strides = array<i32>} : memref<1x8x32xf32, #tpu.memory_space<vmem>>, vector<1x8x32xf32>,
    return
  }
  func.func @transform_0(%arg0: i32, %arg1: i32) -> (i32, i32, i32) {
    %c0_i32 = arith.constant 0 : i32
    %c0_i32_0 = arith.constant 0 : i32
    return %arg0, %arg1, %c0_i32 : i32, i32, i32
  }
  func.func @transform_1(%arg0: i32, %arg1: i32) -> (i32, i32) {
    %c0_i32 = arith.constant 0 : i32
    %c0_i32_0 = arith.constant 0 : i32
    %c0_i32_1 = arith.constant 0 : i32
    return %c0_i32, %c0_i32_0 : i32, i32
  }
  func.func @transform_2(%arg0: i32, %arg1: i32) -> (i32, i32, i32) {
    %c0_i32 = arith.constant 0 : i32
    %c0_i32_0 = arith.constant 0 : i32
    return %arg0, %arg1, %c0_i32 : i32, i32, i32
  }
  func.func @transform_3(%arg0: i32, %arg1: i32) -> (i32, i32, i32) {
    %c0_i32 = arith.constant 0 : i32
    %c0_i32_0 = arith.constant 0 : i32
    return %arg0, %arg1, %c0_i32 : i32, i32, i32
  }
  func.func @transform_4(%arg0: i32, %arg1: i32) -> (i32, i32, i32) {
    %c0_i32 = arith.constant 0 : i32
    %c0_i32_0 = arith.constant 0 : i32
    return %arg0, %arg1, %c0_i32 : i32, i32, i32
  }
}

module attributes {stable_mosaic.version = 11 : i64} {
  func.func @attention_core_kernel(%arg0: i32, %arg1: i32, %arg2: i32, %arg3: memref<1x1x8x8xf32, #tpu.memory_space<vmem>>, %arg4: memref<1x1x8x8xf32, #tpu.memory_space<vmem>>, %arg5: memref<1x1x8x8xf32, #tpu.memory_space<vmem>>, %arg6: memref<1x1x8x8xf32, #tpu.memory_space<vmem>>) attributes {dimension_semantics = [#tpu.dimension_semantics<parallel>, #tpu.dimension_semantics<parallel>, #tpu.dimension_semantics<arbitrary>], iteration_bounds = array<i64: 2, 4, 1>, scalar_prefetch = 0 : i64, scratch_operands = 0 : i64, tpu.core_type = #tpu.core_type<tc>, window_params = [{transform_indices = @transform_0, window_bounds = array<i64: 1, 1, 8, 8>}, {transform_indices = @transform_1, window_bounds = array<i64: 1, 1, 8, 8>}, {transform_indices = @transform_2, window_bounds = array<i64: 1, 1, 8, 8>}, {transform_indices = @transform_3, window_bounds = array<i64: 1, 1, 8, 8>}]} {
    %c0 = arith.constant 0 : index
    %c0_0 = arith.constant 0 : index
    %c0_1 = arith.constant 0 : index
    %c0_2 = arith.constant 0 : index
    %0 = vector.load %arg3[%c0, %c0_0, %c0_1, %c0_2] : memref<1x1x8x8xf32, #tpu.memory_space<vmem>>, vector<1x1x8x8xf32>
    %1 = vector.shape_cast %0 : vector<1x1x8x8xf32> to vector<8x8xf32>
    %c0_3 = arith.constant 0 : index
    %c0_4 = arith.constant 0 : index
    %c0_5 = arith.constant 0 : index
    %c0_6 = arith.constant 0 : index
    %2 = vector.load %arg4[%c0_3, %c0_4, %c0_5, %c0_6] : memref<1x1x8x8xf32, #tpu.memory_space<vmem>>, vector<1x1x8x8xf32>
    %3 = vector.shape_cast %2 : vector<1x1x8x8xf32> to vector<8x8xf32>
    %c0_7 = arith.constant 0 : index
    %c0_8 = arith.constant 0 : index
    %c0_9 = arith.constant 0 : index
    %c0_10 = arith.constant 0 : index
    %4 = vector.load %arg5[%c0_7, %c0_8, %c0_9, %c0_10] : memref<1x1x8x8xf32, #tpu.memory_space<vmem>>, vector<1x1x8x8xf32>
    %5 = vector.shape_cast %4 : vector<1x1x8x8xf32> to vector<8x8xf32>
    %cst = arith.constant dense<0.000000e+00> : vector<8x8xf32>
    %6 = tpu.matmul %1, %3, %cst {dimension_numbers = #tpu.dot_dimension_numbers<[1], [0], [0], [1], [0, 0, 1, 1], [], []>} : vector<8x8xf32>, vector<8x8xf32>, vector<8x8xf32> -> vector<8x8xf32>
    %cst_11 = arith.constant dense<0xFF800000> : vector<8xf32>
    %7 = vector.multi_reduction <maximumf>, %6, %cst_11 [1] : vector<8x8xf32> to vector<8xf32>
    %8 = vector.shape_cast %7 : vector<8xf32> to vector<8x1xf32>
    %9 = vector.broadcast %8 : vector<8x1xf32> to vector<8x8xf32>
    %10 = arith.subf %6, %9 : vector<8x8xf32>
    %11 = math.exp %10 : vector<8x8xf32>
    %cst_12 = arith.constant dense<0.000000e+00> : vector<8xf32>
    %12 = vector.multi_reduction <add>, %11, %cst_12 [1] : vector<8x8xf32> to vector<8xf32>
    %13 = vector.shape_cast %12 : vector<8xf32> to vector<8x1xf32>
    %cst_13 = arith.constant dense<0.000000e+00> : vector<8x8xf32>
    %14 = tpu.matmul %11, %5, %cst_13 {dimension_numbers = #tpu.dot_dimension_numbers<[1], [0], [0], [1], [0, 0, 1, 1], [], []>} : vector<8x8xf32>, vector<8x8xf32>, vector<8x8xf32> -> vector<8x8xf32>
    %15 = tpu.reciprocal %13 {approx = true} : vector<8x1xf32> -> vector<8x1xf32>
    %16 = vector.broadcast %15 : vector<8x1xf32> to vector<8x8xf32>
    %17 = arith.mulf %14, %16 : vector<8x8xf32>
    %c0_14 = arith.constant 0 : index
    %c0_15 = arith.constant 0 : index
    %c0_16 = arith.constant 0 : index
    %c0_17 = arith.constant 0 : index
    %18 = vector.load %arg6[%c0_14, %c0_15, %c0_16, %c0_17] : memref<1x1x8x8xf32, #tpu.memory_space<vmem>>, vector<1x1x8x8xf32>
    %19 = vector.shape_cast %18 : vector<1x1x8x8xf32> to vector<8x8xf32>
    %20 = vector.shape_cast %17 : vector<8x8xf32> to vector<1x1x8x8xf32>
    tpu.vector_store %arg6[%c0_14, %c0_15, %c0_16, %c0_17], %20 {strides = array<i32>} : memref<1x1x8x8xf32, #tpu.memory_space<vmem>>, vector<1x1x8x8xf32>,
    return
  }
  func.func @transform_0(%arg0: i32, %arg1: i32, %arg2: i32) -> (i32, i32, i32, i32) {
    %c0_i32 = arith.constant 0 : i32
    %c0_i32_0 = arith.constant 0 : i32
    return %arg0, %arg1, %arg2, %c0_i32 : i32, i32, i32, i32
  }
  func.func @transform_1(%arg0: i32, %arg1: i32, %arg2: i32) -> (i32, i32, i32, i32) {
    %c0_i32 = arith.constant 0 : i32
    %c0_i32_0 = arith.constant 0 : i32
    %c0_i32_1 = arith.constant 0 : i32
    return %arg0, %arg1, %c0_i32, %c0_i32_0 : i32, i32, i32, i32
  }
  func.func @transform_2(%arg0: i32, %arg1: i32, %arg2: i32) -> (i32, i32, i32, i32) {
    %c0_i32 = arith.constant 0 : i32
    %c0_i32_0 = arith.constant 0 : i32
    %c0_i32_1 = arith.constant 0 : i32
    return %arg0, %arg1, %c0_i32, %c0_i32_0 : i32, i32, i32, i32
  }
  func.func @transform_3(%arg0: i32, %arg1: i32, %arg2: i32) -> (i32, i32, i32, i32) {
    %c0_i32 = arith.constant 0 : i32
    %c0_i32_0 = arith.constant 0 : i32
    return %arg0, %arg1, %arg2, %c0_i32 : i32, i32, i32, i32
  }
}

module attributes {stable_mosaic.version = 11 : i64} {
  func.func @out_proj_kernel(%arg0: i32, %arg1: i32, %arg2: i32, %arg3: memref<1x1x8x8xf32, #tpu.memory_space<vmem>>, %arg4: memref<4x8x32xf32, #tpu.memory_space<vmem>>, %arg5: memref<1x32xf32, #tpu.memory_space<vmem>>, %arg6: memref<1x8x32xf32, #tpu.memory_space<vmem>>, %arg7: memref<8x32xf32, #tpu.memory_space<vmem>>) attributes {dimension_semantics = [#tpu.dimension_semantics<parallel>, #tpu.dimension_semantics<parallel>, #tpu.dimension_semantics<arbitrary>], iteration_bounds = array<i64: 2, 1, 4>, scalar_prefetch = 0 : i64, scratch_operands = 1 : i64, tpu.core_type = #tpu.core_type<tc>, window_params = [{transform_indices = @transform_0, window_bounds = array<i64: 1, 1, 8, 8>}, {pipeline_mode = #tpu.pipeline_mode<synchronous>, transform_indices = @transform_1, window_bounds = array<i64: 4, 8, 32>}, {pipeline_mode = #tpu.pipeline_mode<synchronous>, transform_indices = @transform_2, window_bounds = array<i64: 1, 32>}, {transform_indices = @transform_3, window_bounds = array<i64: 1, 8, 32>}]} {
    %c0_i32 = arith.constant 0 : i32
    %0 = arith.cmpi eq, %arg2, %c0_i32 : i32
    %1 = arith.extui %0 : i1 to i32
    %c0_i32_0 = arith.constant 0 : i32
    %2 = arith.cmpi ne, %1, %c0_i32_0 : i32
    scf.if %2 {
      %cst_11 = arith.constant 0.000000e+00 : f32
      %15 = vector.broadcast %cst_11 : f32 to vector<8x32xf32>
      %c0_12 = arith.constant 0 : index
      %c0_13 = arith.constant 0 : index
      %16 = vector.load %arg7[%c0_12, %c0_13] : memref<8x32xf32, #tpu.memory_space<vmem>>, vector<8x32xf32>
      tpu.vector_store %arg7[%c0_12, %c0_13], %15 {strides = array<i32>} : memref<8x32xf32, #tpu.memory_space<vmem>>, vector<8x32xf32>,
    } else {
    }
    %c0 = arith.constant 0 : index
    %c0_1 = arith.constant 0 : index
    %3 = vector.load %arg7[%c0, %c0_1] : memref<8x32xf32, #tpu.memory_space<vmem>>, vector<8x32xf32>
    %c0_2 = arith.constant 0 : index
    %c0_3 = arith.constant 0 : index
    %c0_4 = arith.constant 0 : index
    %c0_5 = arith.constant 0 : index
    %4 = vector.load %arg3[%c0_2, %c0_3, %c0_4, %c0_5] : memref<1x1x8x8xf32, #tpu.memory_space<vmem>>, vector<1x1x8x8xf32>
    %5 = vector.shape_cast %4 : vector<1x1x8x8xf32> to vector<8x8xf32>
    %6 = arith.index_cast %arg2 : i32 to index
    %c0_6 = arith.constant 0 : index
    %c0_7 = arith.constant 0 : index
    %7 = vector.load %arg4[%6, %c0_6, %c0_7] : memref<4x8x32xf32, #tpu.memory_space<vmem>>, vector<1x8x32xf32>
    %8 = vector.shape_cast %7 : vector<1x8x32xf32> to vector<8x32xf32>
    %cst = arith.constant dense<0.000000e+00> : vector<8x32xf32>
    %9 = tpu.matmul %5, %8, %cst {dimension_numbers = #tpu.dot_dimension_numbers<[1], [0], [0], [1], [0, 0, 1, 1], [], []>} : vector<8x8xf32>, vector<8x32xf32>, vector<8x32xf32> -> vector<8x32xf32>
    %10 = arith.addf %3, %9 : vector<8x32xf32>
    %c0_8 = arith.constant 0 : index
    %c0_9 = arith.constant 0 : index
    %11 = vector.load %arg7[%c0_8, %c0_9] : memref<8x32xf32, #tpu.memory_space<vmem>>, vector<8x32xf32>
    tpu.vector_store %arg7[%c0_8, %c0_9], %10 {strides = array<i32>} : memref<8x32xf32, #tpu.memory_space<vmem>>, vector<8x32xf32>,
    %c3_i32 = arith.constant 3 : i32
    %12 = arith.cmpi eq, %arg2, %c3_i32 : i32
    %13 = arith.extui %12 : i1 to i32
    %c0_i32_10 = arith.constant 0 : i32
    %14 = arith.cmpi ne, %13, %c0_i32_10 : i32
    scf.if %14 {
      %c0_11 = arith.constant 0 : index
      %c0_12 = arith.constant 0 : index
      %15 = vector.load %arg7[%c0_11, %c0_12] : memref<8x32xf32, #tpu.memory_space<vmem>>, vector<8x32xf32>
      %c0_13 = arith.constant 0 : index
      %c0_14 = arith.constant 0 : index
      %16 = vector.load %arg5[%c0_13, %c0_14] : memref<1x32xf32, #tpu.memory_space<vmem>>, vector<1x32xf32>
      %17 = vector.broadcast %16 : vector<1x32xf32> to vector<8x32xf32>
      %18 = arith.addf %15, %17 : vector<8x32xf32>
      %c0_15 = arith.constant 0 : index
      %c0_16 = arith.constant 0 : index
      %c0_17 = arith.constant 0 : index
      %19 = vector.load %arg6[%c0_15, %c0_16, %c0_17] : memref<1x8x32xf32, #tpu.memory_space<vmem>>, vector<1x8x32xf32>
      %20 = vector.shape_cast %19 : vector<1x8x32xf32> to vector<8x32xf32>
      %21 = vector.shape_cast %18 : vector<8x32xf32> to vector<1x8x32xf32>
      tpu.vector_store %arg6[%c0_15, %c0_16, %c0_17], %21 {strides = array<i32>} : memref<1x8x32xf32, #tpu.memory_space<vmem>>, vector<1x8x32xf32>,
    } else {
    }
    return
  }
  func.func @transform_0(%arg0: i32, %arg1: i32, %arg2: i32) -> (i32, i32, i32, i32) {
    %c0_i32 = arith.constant 0 : i32
    %c0_i32_0 = arith.constant 0 : i32
    return %arg0, %arg2, %arg1, %c0_i32 : i32, i32, i32, i32
  }
  func.func @transform_1(%arg0: i32, %arg1: i32, %arg2: i32) -> (i32, i32, i32) {
    %c0_i32 = arith.constant 0 : i32
    %c0_i32_0 = arith.constant 0 : i32
    %c0_i32_1 = arith.constant 0 : i32
    %c0_i32_2 = arith.constant 0 : i32
    return %c0_i32, %c0_i32_0, %c0_i32_1 : i32, i32, i32
  }
  func.func @transform_2(%arg0: i32, %arg1: i32, %arg2: i32) -> (i32, i32) {
    %c0_i32 = arith.constant 0 : i32
    %c0_i32_0 = arith.constant 0 : i32
    %c0_i32_1 = arith.constant 0 : i32
    return %c0_i32, %c0_i32_0 : i32, i32
  }
  func.func @transform_3(%arg0: i32, %arg1: i32, %arg2: i32) -> (i32, i32, i32) {
    %c0_i32 = arith.constant 0 : i32
    %c0_i32_0 = arith.constant 0 : i32
    return %arg0, %arg1, %c0_i32 : i32, i32, i32
  }
}

</mosaic_0001>

<bundles_post_ra>
// kernel: _attention_jit.5
= control target key start
LH: loop header
LB: loop body
LE: loop exit
PB: predicated region body
PF: predicated region fallthrough
CT: control target
= control target key end

     0   :  { %8 = vsyncpa [#allocation4], 0  ;;  %s704_s0 = inlined_call_operand.vmem [shape: f32[2,4,8,8], index: 0, kind: input, shape index: {}]   ;;  %s705_s1 = inlined_call_operand.vmem [shape: f32[4,8,32], index: 1, kind: input, shape index: {}]   ;;  %s706_s2 = inlined_call_operand.vmem [shape: f32[1,32], index: 2, kind: input, shape index: {}]   ;;  %s707_s3 = inlined_call_operand.hbm [shape: f32[2,8,32], index: 3, kind: output, shape index: {}]  }
   0x1   :  { %10 = vsyncpa [#allocation4 + $0x1], 0  ;;  %s569_s12 = smov 0   ;;  %s571_s13 = smov 0  }
   0x2   :  { %s573_s14 = smov 0   ;;  %s575_s15 = smov 0  }
   0x3   :  { %s577_s16 = smov 0   ;;  %s579_s17 = smov 0  }
   0x4   :  { %s581_s18 = smov 0   ;;  %s583_s19 = smov 0  }
   0x5 LB: > { %s363_s20 = sadd.s32 4294967295, %s546_s19   ;;  %s364_s21 = sadd.s32 4294967294, %s546_s19   ;;  %s546_s19 = sphi %s583_s19, %s16_s19   ;;  %s542_s18 = sphi %s581_s18, %s716_s18   ;;  %s538_s17 = sphi %s579_s17, %s715_s17   ;;  %s534_s16 = sphi %s577_s16, %s714_s16   ;;  %s530_s15 = sphi %s575_s15, %s713_s15   ;;  %s526_s14 = sphi %s573_s14, %s712_s14   ;;  %s522_s13 = sphi %s571_s13, %s711_s13   ;;  %s518_s12 = sphi %s569_s12, %s710_s12  }
   0x6   : > { %s28_s22 = sadd.s32 1, %s538_s17  ;;  %s35_s23 = sadd.s32 1, %s542_s18 }
   0x7   : > { %p29_p0 = scmp.ge.s32.totalorder %s28_s22, 4  ;;  %p126_p1 = scmp.ne.s32.totalorder %s526_s14, %s522_s13 }
   0x8   : > { %p127_p2 = scmp.eq.s32.totalorder %s363_s20, 7  ;;  %p132_p4 = scmp.ne.s32.totalorder %s522_s13, %s518_s12 }
   0x9   : > { %s718_s22 = smov (%p29_p0, %s28_s22), 0  ;;  %s720_s23 = smov (!%p29_p0, %s35_s23), %s542_s18 }
   0xa   : > { %p618_p3 = por %p127_p2, %p126_p1  ;;  %p37_p5 = scmp.ge.s32.totalorder %s720_s23, 2 }
   0xb   : > { %p133_p6 = scmp.eq.s32.totalorder %s364_s21, 7  ;;  %p367_p7 = scmp.ge.s32.totalorder %s546_s19, 1 }
   0xc   : > { %p171_p8 = scmp.lt.s32.totalorder %s546_s19, 9  ;;  %s722_s23 = smov (%p37_p5, %s720_s23), 0 }
   0xd   : > { %p628_p9 = por %p133_p6, %p132_p4  ;;  %s111_s26 = ssub.s32 %s542_s18, %s722_s23 }
   0xe   : > { %p172_p10 = pnand %p367_p7, %p171_p8  ;;  %s116_s27 = sadd.s32 1, %s526_s14 }
   0xf   : > { %p114_p11 = scmp.eq.s32.totalorder %s111_s26, 0  ;;  %s198_s29 = sand.u32 (!%p172_p10), 1, %s522_s13  }
  0x10   : > { %175 = sbr.rel (%p172_p10) target bundleno = 188 (0xbc), region = 32  ;;  %p201_p12 = scmp.lt.s32.totalorder (!%p172_p10), %s534_s16, 1 }
  0x11   : > { %s636_s28 = scalar_select %p114_p11, %s526_s14, %s116_s27  }
  0x12   : > { %s642_s30 = sshll.u32 (!%p172_p10), %s198_s29, 3  ;;  %p203_p13 = scmp.lt.s32.totalorder (!%p172_p10), %s530_s15, 3 }
  0x13   : > { %s200_s20 = scalar_lea.vmem (!%p172_p10), [#allocation3], %s642_s30  ;;  %p371_p0 = scmp.ne.s32.totalorder (!%p172_p10), %s530_s15, 0 }
  0x15   : > { %s202_s4 = scalar_select %p201_p12, %s534_s16, 1 }
  0x16   : > { %s204_s5 = scalar_select %p203_p13, %s530_s15, 3 }
  0x17   : > { %s369_s6 = sshll.u32 %s202_s4, 2  ;;  %215 = sbr.rel (%p371_p0) target bundleno = 30 (0x1e), region = 36 }
  0x18   : > { %s209_s7 = sadd.s32 %s369_s6, %s204_s5 }
  0x19   : > { %s370_s8 = sshll.u32 %s209_s7, 3 }
  0x1a   : > { %s211_s11 = scalar_lea.vmem %s704_s0, %s370_s8 }
  0x1c   : > { %vm216_vm0 = vcmask 261120   ;;  %v548_v0 = vmov 0.0  }
  0x1d   : > { %217 = vst.msk [vmem:[#allocation2] sm:$0xff] %vm216_vm0, %v548_v0 }
  0x1e PF: > { %s372_s21 = sshll.u32 %s530_s15, 3  ;;  %v219_v1 = vld [vmem:[%s211_s11] sm:$0xff]  ;;  %vm223_vm1 = vcmask 64512   ;;  %vm248_vm2 = vcmask 261120   ;;  %p374_p1 = scmp.ne.s32.totalorder %s530_s15, 3 }
  0x1f   : > { %s221_s4 = scalar_lea.vmem %s705_s1, %s372_s21 }
  0x20   : > { %v222_v2 = vld [vmem:[%s221_s4] sm:$0xff] }
  0x21   : > { %242 = vmatpush.msra.mxu0 %v222_v2 }
  0x22   : > { %373 = vmatmul.msk.f32.vlgmr.msra.gmra.mxu0 %vm223_vm1, %v219_v1 }
  0x24   : > { %v218_v3 = vld [vmem:[#allocation2] sm:$0xff] }
  0x9e   : > { %253 = sbr.rel (%p374_p1) target bundleno = 173 (0xad), region = 40 }
  0x9f   : > { %v244_v4 = vpop.f32.mrf.mxu0 }
  0xa0   : > { %v247_v5 = vadd.f32 %v244_v4, %v218_v3 }
  0xa2   : > { %249 = vst.msk [vmem:[#allocation2] sm:$0xff] %vm248_vm2, %v247_v5 }
  0xa3   : > { %v451_v7 = vld [vmem:[%s706_s2] ss:$0 sm:$0xff] }
  0xa9   : > { %v254_v6 = vld [vmem:[#allocation2] sm:$0xff] }
  0xaa   : > { %v259_v8 = vadd.f32 %v451_v7, %v254_v6 }
  0xac   : > { %260 = vst.msk [vmem:[%s200_s20] sm:$0xff] %vm248_vm2, %v259_v8 }
  0xad PF: > { %s376_s6 = sshll.u32 %s534_s16, 3  ;;  %s275_s10 = sshll.u32 %s200_s20, 4  ;;  %s276_s10 = int_to_ptr.vmem [resolvable:$true] %s275_s10 }
  0xae   : > { %s273_s9 = scalar_lea.hbm %s707_s3, %s376_s6  ;;  %s262_s11 = scalar_lea.sflag [#allocation4], %s198_s29 }
  0xaf   : > { %s277_s15 = sshll.u32 %s273_s9, 4  ;;  %s472_s16 = scalar_lea.hbm %s707_s3, 16  ;;  %s278_s15 = int_to_ptr.hbm [resolvable:$true] %s277_s15 }
  0xb0   : > { %s466_s21 = sshra.s32 %s278_s15, 4  ;;  %s467_s21 = int_to_ptr.hbm [resolvable:$true] %s466_s21 }
  0xb1   : > { %s468_s26 = scalar_lea.hbm %s467_s21, 8  ;;  %p473_p6 = scmp.lt.s32.totalorder %s467_s21, %s707_s3 }
  0xb2   : > { %p469_p2 = scmp.ne.s32.totalorder %s467_s21, %s468_s26  ;;  %p474_p7 = scmp.lt.s32.totalorder %s472_s16, %s468_s26 }
  0xb4   : > { %p470_p4 = pnand %p469_p2, %p618_p3  ;;  %p475_p8 = por %p474_p7, %p473_p6 }
  0xb6   : > { %p471_p5 = pneg %p470_p4 }
  0xb8   : > { %p476_p10 = pnand %p475_p8, %p471_p5 }
  0xba   : > { %479 = shalt.err (!%p476_p10)
}
  0xbb   : > { %379 = dma.vmem_to_hbm [thread:$0]  (%p618_p3), %s276_s10, 128, %s278_s15, %s262_s11  }
  0xbc PF: > { %p385_p11 = scmp.ge.s32.totalorder %s546_s19, 2  ;;  %s289_s29 = sand.u32 1, %s518_s12  }
  0xbd   : > { %s290_s20 = scalar_lea.sflag [#allocation4], %s289_s29 }
  0xbe   : > { %p382_p12 = pnand %p385_p11, %p628_p9 }
  0xc0   : > { %p383_p13 = pneg %p382_p12 }
  0xc2   : > { %513 = dma.done.wait (%p383_p13), %s290_s20, 128  }
  0xc3   : > { %515 = vsyncadd (%p383_p13), %s290_s20, 4294967168  ;;  %s16_s19 = sadd.s32 1, %s546_s19   ;;  %s710_s12 = smov %s522_s13 }
  0xc4   : > { %p13_p0 = scmp.ge.s32.totalorder %s16_s19, 10   ;;  %s711_s13 = smov %s526_s14 }
  0xc5   : > { %s712_s14 = smov %s636_s28  ;;  %s713_s15 = smov %s538_s17 }
  0xc6   : > { %s714_s16 = smov %s542_s18  ;;  %s715_s17 = smov %s718_s22 }
  0xc7   : > { %s716_s18 = smov %s722_s23  ;;  %15 = sbr.rel (!%p13_p0) target bundleno = 5 (0x5), region = 76 }
  0xcc   :  { %296 = vsyncpa [#allocation4], 1 }
  0xcd   :  { %298 = vsyncpa [#allocation4 + $0x1], 1 }

// kernel: _attention_jit.4
= control target key start
LH: loop header
LB: loop body
LE: loop exit
PB: predicated region body
PF: predicated region fallthrough
CT: control target
= control target key end

     0   :  { %s611_s12 = smov 0   ;;  %s613_s13 = smov 0   ;;  %s673_s0 = inlined_call_operand.vmem [shape: f32[2,4,8,8], index: 0, kind: input, shape index: {}]   ;;  %s674_s1 = inlined_call_operand.vmem [shape: f32[2,4,8,8], index: 1, kind: input, shape index: {}]   ;;  %s675_s2 = inlined_call_operand.vmem [shape: f32[2,4,8,8], index: 2, kind: input, shape index: {}]   ;;  %s676_s3 = inlined_call_operand.vmem [shape: f32[2,4,8,8], index: 3, kind: output, shape index: {}]  }
   0x1   :  { %s615_s14 = smov 0   ;;  %s617_s15 = smov 0  }
   0x2   :  { %s619_s16 = smov 0  }
   0x3 LB: > { %s28_s17 = sadd.s32 1, %s581_s14  ;;  %s32_s18 = sadd.s32 1, %s585_s15  ;;  %s589_s16 = sphi %s619_s16, %s13_s16   ;;  %s585_s15 = sphi %s617_s15, %s680_s15   ;;  %s581_s14 = sphi %s615_s14, %s679_s14   ;;  %s577_s13 = sphi %s613_s13, %s678_s13   ;;  %s573_s12 = sphi %s611_s12, %s677_s12  }
   0x4   : > { %p30_p0 = scmp.ge.s32.totalorder %s28_s17, 4  ;;  %p494_p1 = scmp.ge.s32.totalorder %s589_s16, 1 }
   0x5   : > { %p200_p2 = scmp.lt.s32.totalorder %s589_s16, 9 }
   0x6   : > { %s682_s17 = smov (%p30_p0, %s28_s17), 0  ;;  %s684_s18 = smov (!%p30_p0, %s32_s18), %s585_s15 }
   0x7   : > { %p201_p3 = pnand %p494_p1, %p200_p2  ;;  %p34_p4 = scmp.ge.s32.totalorder %s684_s18, 2 }
   0x8   : > { %p252_p5 = scmp.lt.s32.totalorder (!%p201_p3), %s577_s13, 1  ;;  %p254_p6 = scmp.lt.s32.totalorder (!%p201_p3), %s573_s12, 3 }
   0x9   : > { %s686_s18 = smov (%p34_p4, %s684_s18), 0  ;;  %204 = sbr.rel (%p201_p3) target bundleno = 404 (0x194), region = 32 }
   0xe   : > { %s688_s13 = smov (!%p252_p5, %s577_s13), 1  ;;  %s690_s12 = smov (!%p254_p6, %s573_s12), 3  ;;  %vm293_vm0 = vcmask 64512  }
   0xf   : > { %s495_s19 = sshll.u32 %s688_s13, 2 }
  0x10   : > { %s260_s20 = sadd.s32 %s495_s19, %s690_s12 }
  0x11   : > { %s496_s21 = sshll.u32 %s260_s20, 3 }
  0x12   : > { %s270_s24 = scalar_lea.vmem %s674_s1, %s496_s21  ;;  %s262_s27 = scalar_lea.vmem %s673_s0, %s496_s21 }
  0x13   : > { %v291_v0 = vld [vmem:[%s270_s24] sm:$0xff]  ;;  %s278_s30 = scalar_lea.vmem %s675_s2, %s496_s21  ;;  %s289_s6 = scalar_lea.vmem %s676_s3, %s496_s21 }
  0x14   : > { %v290_v1 = vld [vmem:[%s262_s27] sm:$0xff]  ;;  %312 = vmatpush.msra.mxu0 %v291_v0 }
  0x15   : > { %503 = vmatmul.msk.f32.vlgmr.msra.gmra.mxu0 %vm293_vm0, %v290_v1  ;;  %v292_v4 = vld [vmem:[%s278_s30] sm:$0xff] }
  0x16   : > { %344 = vmatpush.msra.mxu1 %v292_v4 }
  0x92   : > { %v314_v2 = vpop.f32.mrf.mxu0 }
  0x93   : > { %v317_v3 = vsel %vm293_vm0, %v314_v2, -inf }
  0x94   : > { %318 = vmax.xlane.f32.xlu0 %v317_v3 }
 0x107   : > { %v319_v5 = vpop.xlane.xlu0 %318 }
 0x108   : > { %v320_v6 = vsub.f32 %v314_v2, %v319_v5 }
 0x10a   : > { %v321_v7 = vmul.f32 1.442695, %v320_v6 }
 0x10c   : > { %547 = vpow2.f32 %v321_v7 }
 0x112   : > { %v548_v8 = vpop.eup %547 }
 0x113   : > { %504 = vmatmul.msk.f32.vlgmr.msra.gmra.mxu1 %vm293_vm0, %v548_v8  ;;  %v323_v9 = vsel %vm293_vm0, %v548_v8, 0.0 }
 0x114   : > { %324 = vadd.xlane.f32.xlu0 %v323_v9 }
 0x187   : > { %v325_v10 = vpop.xlane.xlu0 %324 }
 0x188   : > { %549 = vrcp.f32 %v325_v10 }
 0x18e   : > { %v550_v11 = vpop.eup %549 }
 0x190   : > { %v346_v12 = vpop.f32.mrf.mxu1 }
 0x191   : > { %v350_v13 = vmul.f32 %v550_v11, %v346_v12 }
 0x193   : > { %351 = vst.msk [vmem:[%s289_s6] sm:$0xff] %vm293_vm0, %v350_v13 }
 0x194 PF: > { %s13_s16 = sadd.s32 1, %s589_s16   ;;  %s677_s12 = smov %s581_s14 }
 0x195   : > { %p10_p7 = scmp.ge.s32.totalorder %s13_s16, 10   ;;  %s678_s13 = smov %s585_s15 }
 0x196   : > { %s679_s14 = smov %s682_s17  ;;  %s680_s15 = smov %s686_s18 }
 0x197   :  { %12 = sbr.rel (!%p10_p7) target bundleno = 3 (0x3), region = 68 }

// kernel: _attention_jit.3
= control target key start
LH: loop header
LB: loop body
LE: loop exit
PB: predicated region body
PF: predicated region fallthrough
CT: control target
= control target key end

     0   :  { %10 = vsyncpa [#allocation3], 0  ;;  %s863_s0 = inlined_call_operand.hbm [shape: f32[2,8,32], index: 0, kind: input, shape index: {}]   ;;  %s864_s1 = inlined_call_operand.hbm [shape: f32[32,96], index: 1, kind: input, shape index: {}]   ;;  %s865_s2 = inlined_call_operand.vmem [shape: f32[2,8,32], index: 2, kind: output, shape index: {0}]   ;;  %s866_s3 = inlined_call_operand.vmem [shape: f32[2,8,32], index: 3, kind: output, shape index: {1}]   ;;  %s867_s4 = inlined_call_operand.vmem [shape: f32[2,8,32], index: 4, kind: output, shape index: {2}]  }
   0x1   :  { %12 = vsyncpa [#allocation3 + $0x1], 0 }
   0x2   :  { %13 = vsyncpa [#allocation5], 0  ;;  %s739_s15 = smov 0   ;;  %s741_s16 = smov 0  }
   0x3   :  { %s743_s17 = smov 0   ;;  %s745_s18 = smov 0  }
   0x4   :  { %s747_s19 = smov 0   ;;  %s749_s20 = smov 0  }
   0x5 LB: > { %s507_s21 = sadd.s32 4294967295, %s707_s20   ;;  %p509_p0 = scmp.ge.s32.totalorder %s707_s20, 1  ;;  %s707_s20 = sphi %s749_s20, %s19_s20   ;;  %s703_s19 = sphi %s747_s19, %s876_s19   ;;  %s699_s18 = sphi %s745_s18, %s875_s18   ;;  %s695_s17 = sphi %s743_s17, %s874_s17   ;;  %s691_s16 = sphi %s741_s16, %s873_s16   ;;  %s687_s15 = sphi %s739_s15, %s872_s15  }
   0x6   : > { %p771_p1 = scmp.eq.s32.totalorder %s507_s21, 0  ;;  %p169_p2 = scmp.lt.s32.totalorder %s707_s20, 3 }
   0x7   : > { %s180_s25 = sshll.u32 %s864_s1, 4  ;;  %s709_s27 = smov [#allocation4]   ;;  %s181_s25 = int_to_ptr.hbm [resolvable:$true] %s180_s25 }
   0x8   : > { %p779_p3 = pnand %p509_p0, %p169_p2  ;;  %s182_s28 = sshll.u32 %s709_s27, 4  ;;  %s183_s28 = int_to_ptr.vmem [resolvable:$true] %s182_s28 }
   0x9   : > { %s710_s29 = smov 128   ;;  %s711_s30 = smov 8  }
   0xa   : > { %p529_p4 = pneg %p779_p3  ;;  %s31_s5 = sadd.s32 1, %s703_s19 }
   0xb   : > { %p33_p6 = scmp.ge.s32.totalorder %s31_s5, 2  ;;  %p47_p7 = scmp.ne.s32.totalorder %s695_s17, %s691_s16 }
   0xc   : > { %p530_p5 = pnand %p529_p4, %p771_p1  ;;  %p48_p8 = scmp.eq.s32.totalorder %s707_s20, 0 }
   0xd   : > { %s878_s5 = smov (%p33_p6, %s31_s5), 0  ;;  %s40_s6 = sadd.s32 1, %s695_s17 }
   0xe   : > { %532 = dma.hbm_to_vmem [thread:$0]  (!%p530_p5), %s181_s25, 512, %s183_s28, [#allocation5], %s710_s29, %s710_s29, %s711_s30  }
   0xf   : > { %p53_p9 = scmp.ne.s32.totalorder %s691_s16, %s687_s15  ;;  %s35_s7 = ssub.s32 %s703_s19, %s878_s5 }
  0x10   : > { %p798_p10 = por %p48_p8, %p47_p7  ;;  %p38_p11 = scmp.eq.s32.totalorder %s35_s7, 0 }
  0x11   : > { %p804_p12 = por %p771_p1, %p53_p9  ;;  %s196_s10 = sand.u32 1, %s695_s17  }
  0x12   : > { %s513_s11 = sshll.u32 %s703_s19, 3  ;;  %p538_p13 = scmp.lt.s32.totalorder %s707_s20, 2 }
  0x13   : > { %s811_s12 = scalar_select %p38_p11, %s695_s17, %s40_s6  }
  0x14   : > { %s512_s13 = sshll.u32 %s196_s10, 3  ;;  %s205_s21 = scalar_lea.hbm %s863_s0, %s513_s11 }
  0x15   : > { %s207_s23 = sshll.u32 %s205_s21, 4  ;;  %s200_s24 = scalar_lea.vmem [#allocation2], %s512_s13  ;;  %s208_s23 = int_to_ptr.hbm [resolvable:$true] %s207_s23 }
  0x16   : > { %s209_s25 = sshll.u32 %s200_s24, 4  ;;  %p534_p0 = pnand %p538_p13, %p798_p10  ;;  %s210_s25 = int_to_ptr.vmem [resolvable:$true] %s209_s25 }
  0x17   : > { %s197_s27 = scalar_lea.sflag [#allocation3], %s196_s10  ;;  %218 = sbr.rel (%p779_p3) target bundleno = 289 (0x121), region = 28 }
  0x18   : > { %536 = dma.hbm_to_vmem [thread:$0]  (!%p534_p0), %s208_s23, 128, %s210_s25, %s197_s27  }
  0x19   : > { %s220_s28 = sand.u32 (!%p779_p3), 1, %s691_s16  }
  0x1a   : > { %s515_s29 = sshll.u32 (!%p779_p3), %s220_s28, 3  ;;  %s221_s30 = scalar_lea.sflag (!%p779_p3), [#allocation3], %s220_s28 }
  0x1b   : > { %s224_s6 = scalar_lea.vmem (!%p779_p3), [#allocation2], %s515_s29 }
  0x1c   : > { %678 = dma.done.wait (%p804_p12), %s221_s30, 128  }
  0x1d   : > { %680 = vsyncadd (%p804_p12), %s221_s30, 4294967168 }
  0x1e   : > { %682 = dma.done.wait (%p771_p1), [#allocation5], 512  }
  0x1f   : > { %684 = vsyncadd (%p771_p1), [#allocation5], 4294966784  ;;  %v296_v0 = vld [vmem:[#allocation4 + $0x18] sm:$0xff]  ;;  %v295_v1 = vld [vmem:[#allocation4 + $0x10] sm:$0xff]  ;;  %vm297_vm0 = vcmask 261120   ;;  %p271_p2 = scmp.lt.s32.totalorder %s699_s18, 1 }
  0x20   : > { %313 = vmatpush.msra.mxu0 %v296_v0  ;;  %v294_v2 = vld [vmem:[#allocation4 + $0x8] sm:$0xff]  ;;  %v293_v3 = vld [vmem:[#allocation4] sm:$0xff]  ;;  %v292_v4 = vld [vmem:[%s224_s6] sm:$0xff]  ;;  %s712_s9 = smov 96   ;;  %s713_s10 = smov 64  }
  0x21   : > { %s880_s18 = smov (!%p271_p2, %s699_s18), 1 }
  0x22   : > { %314 = vmatpush.msra.mxu0 %v295_v1  ;;  %s517_s26 = sshll.u32 %s880_s18, 3 }
  0x23   : > { %s277_s8 = scalar_lea.vmem %s865_s2, %s517_s26  ;;  %s284_s14 = scalar_lea.vmem %s866_s3, %s517_s26 }
  0x24   : > { %315 = vmatpush.msra.mxu0 %v294_v2  ;;  %s291_s21 = scalar_lea.vmem %s867_s4, %s517_s26 }
  0x26   : > { %316 = vmatpush.msra.mxu0 %v293_v3 }
  0x27   : > { %520 = vmatmul.msk.f32.vlgmr.msra.gmra.mxu0 %vm297_vm0, %v292_v4 }
  0xa4   : > { %v318_v5 = vpop.f32.mrf.mxu0 }
  0xa5   : > { %321 = vst.msk [vmem:[%s277_s8] sm:$0xff] %vm297_vm0, %v318_v5  ;;  %323 = vrot.lane.b32.xlu0 %v318_v5, %s712_s9 }
  0xad   : > { %327 = vrot.lane.b32.xlu0 %v318_v5, %s713_s10 }
 0x117   : > { %v324_v6 = vpop.permute.xlu0 %323 }
 0x118   : > { %326 = vst.msk [vmem:[%s284_s14] sm:$0xff] %vm297_vm0, %v324_v6 }
 0x11f   : > { %v328_v7 = vpop.permute.xlu0 %327 }
 0x120   : > { %330 = vst.msk [vmem:[%s291_s21] sm:$0xff] %vm297_vm0, %v328_v7 }
 0x121 PF: > { %s19_s20 = sadd.s32 1, %s707_s20   ;;  %s872_s15 = smov %s691_s16 }
 0x122   : > { %p16_p1 = scmp.ge.s32.totalorder %s19_s20, 4   ;;  %s873_s16 = smov %s695_s17 }
 0x123   : > { %s874_s17 = smov %s811_s12  ;;  %s875_s18 = smov %s703_s19 }
 0x124   : > { %s876_s19 = smov %s878_s5  ;;  %18 = sbr.rel (!%p16_p1) target bundleno = 5 (0x5), region = 96 }
 0x129   :  { %396 = vsyncpa [#allocation3], 1 }
 0x12a   :  { %398 = vsyncpa [#allocation3 + $0x1], 1 }
 0x12b   :  { %399 = vsyncpa [#allocation5], 1 }

</bundles_post_ra>
